<compile_context>
chip_gen: v6e
topology: v6e:2x2x1
jax: 0.10.0
libtpu: 0.0.40
codegen_flags: <defaults>
</compile_context>

<pallas_src>
import math
from functools import partial

import jax
import jax.numpy as jnp
from jax.experimental import pallas as pl
from jax.experimental.pallas import tpu as pltpu


def _field_embed_kernel(idx_ref, wt_ref, out_ref, *, p: int, embed_dim: int):
    """Gather kernel.

    idx_ref: (tn, p)    int32 indices in [0, p)
    wt_ref:  (p, p*E)   float32; row k is renormalized embedding row k tiled p
                        times along lanes: wt_ref[k, j*E + e] = w_renorm[k, e]
    out_ref: (tn, p*E)  float32 lane-dense output,
                        out[i, j*E + e] = w_renorm[idx[i, j], e]
    """
    tn = idx_ref.shape[0]
    width = p * embed_dim

    idx = idx_ref[...]                                              # (tn, p)
    # Lane-expand the indices: idx_x[i, j*E + e] = idx[i, j].
    idx_x = jnp.broadcast_to(idx[:, :, None], (tn, p, embed_dim)).reshape(tn, width)

    # Unrolled VPU select over the (small, static) number of table rows.
    # Out-of-range indices yield zeros (same as the previous one-hot version).
    acc = jnp.zeros((tn, width), jnp.float32)
    for k in range(p):
        row_k = wt_ref[k:k + 1, :]                                  # (1, p*E)
        acc = jnp.where(idx_x == k, row_k, acc)

    out_ref[...] = acc.astype(out_ref.dtype)


def field_embed(coeffs, weight, *, max_norm: float, tile_rows=None):
    """coeffs: int array (..., p); weight: (p, E) float32. Returns (..., p, E)."""
    p, embed_dim = weight.shape
    assert coeffs.shape[-1] == p
    lead = coeffs.shape[:-1]
    n = int(math.prod(lead))
    width = p * embed_dim

    coeffs_flat = coeffs.reshape(n, p).astype(jnp.int32)

    # Hoisted renorm (torch.embedding_renorm_, norm_type=2, eps=1e-7); then
    # lane-tile the table so kernel rows broadcast directly against (tn, p*E).
    w = weight.astype(jnp.float32)
    norm = jnp.sqrt(jnp.sum(w * w, axis=-1, keepdims=True))
    scale = jnp.where(norm > max_norm, max_norm / (norm + 1e-7), 1.0)
    w_tiled = jnp.tile(w * scale, (1, p))                            # (p, p*E)

    # ---- tile-size selection (VMEM-budgeted; amortize ~0.35us/step overhead) ----
    out_row_bytes = width * 4                    # f32 lane-dense output row
    idx_row_bytes = max(p, 128) * 4              # int32 index row pads lanes -> 128
    tile_budget_bytes = 24 * 1024 * 1024         # double-buffered in + out tiles
    if tile_rows is None:
        budget_rows = tile_budget_bytes // (2 * (out_row_bytes + idx_row_bytes))
        tile_rows = int(max(8, min((budget_rows // 8) * 8, 4096)))
        if n >= 16:
            # keep >= 2 grid steps so the parallel axis can use both v7x cores
            tile_rows = min(tile_rows, max(8, ((n // 2) // 8) * 8))

    if n <= tile_rows:
        tn = n                                   # single full-extent block
        n_pad = n
    else:
        tn = max(8, (int(tile_rows) // 8) * 8)   # second-to-last dim: multiple of 8
        n_pad = ((n + tn - 1) // tn) * tn
        if n_pad != n:
            coeffs_flat = jnp.pad(coeffs_flat, ((0, n_pad - n), (0, 0)))
    grid = (n_pad // tn,)

    out = pl.pallas_call(
        partial(_field_embed_kernel, p=p, embed_dim=embed_dim),
        out_shape=jax.ShapeDtypeStruct((n_pad, width), jnp.float32),
        grid_spec=pltpu.PrefetchScalarGridSpec(
            num_scalar_prefetch=0,
            grid=grid,
            in_specs=[
                pl.BlockSpec((tn, p), lambda i: (i, 0)),        # index tile
                pl.BlockSpec((p, width), lambda i: (0, 0)),     # full tiled table
            ],
            out_specs=pl.BlockSpec((tn, width), lambda i: (i, 0)),
        ),
        compiler_params=pltpu.CompilerParams(
            dimension_semantics=("parallel",),
            vmem_limit_bytes=48 * 1024 * 1024,
        ),
    )(coeffs_flat, w_tiled)

    return out[:n].reshape(*lead, p, embed_dim)


def field_embed_ref(coeffs, weight, *, max_norm: float):
    """Pure-JAX reference of the PyTorch forward."""
    norm = jnp.sqrt(jnp.sum(weight * weight, axis=-1, keepdims=True))
    scale = jnp.where(norm > max_norm, max_norm / (norm + 1e-7), 1.0)
    return jnp.take(weight * scale, coeffs, axis=0)


if __name__ == "__main__":
    # FieldEmbed(p=7, embed_dim=32)
    p = 7
    embed_dim = 32
    max_norm = math.sqrt(embed_dim)

    key = jax.random.PRNGKey(0)
    k_w, k_c1, k_c2 = jax.random.split(key, 3)

    # nn.Embedding default init: N(0, 1)
    weight = jax.random.normal(k_w, (p, embed_dim), dtype=jnp.float32)

    # Small batch: single full-extent block path.
    coeffs_a = jax.random.randint(k_c1, (2, 4, p), minval=0, maxval=p, dtype=jnp.int32)
    out_a = jax.block_until_ready(field_embed(coeffs_a, weight, max_norm=max_norm))
    ref_a = field_embed_ref(coeffs_a, weight, max_norm=max_norm)
    assert out_a.shape == (2, 4, p, embed_dim), out_a.shape
    assert jnp.allclose(out_a, ref_a, atol=1e-5, rtol=1e-5), (
        float(jnp.max(jnp.abs(out_a - ref_a)))
    )

    # Larger batch: exercises the tiled multi-step grid + row-padding path.
    coeffs_b = jax.random.randint(k_c2, (3, 10, p), minval=0, maxval=p, dtype=jnp.int32)
    out_b = jax.block_until_ready(field_embed(coeffs_b, weight, max_norm=max_norm))
    ref_b = field_embed_ref(coeffs_b, weight, max_norm=max_norm)
    assert out_b.shape == (3, 10, p, embed_dim), out_b.shape
    assert jnp.allclose(out_b, ref_b, atol=1e-5, rtol=1e-5), (
        float(jnp.max(jnp.abs(out_b - ref_b)))
    )

    print("KERNEL_OK")
</pallas_src>

<mosaic_0001>
module attributes {stable_mosaic.version = 11 : i64} {
  func.func @_field_embed_kernel(%arg0: i32, %arg1: memref<8x7xi32, #tpu.memory_space<vmem>>, %arg2: memref<7x224xf32, #tpu.memory_space<vmem>>, %arg3: memref<8x224xf32, #tpu.memory_space<vmem>>) attributes {dimension_semantics = [#tpu.dimension_semantics<parallel>], iteration_bounds = array<i64: 1>, scalar_prefetch = 0 : i64, scratch_operands = 0 : i64, tpu.core_type = #tpu.core_type<tc>, window_params = [{transform_indices = @transform_0, window_bounds = array<i64: 8, 7>}, {pipeline_mode = #tpu.pipeline_mode<synchronous>, transform_indices = @transform_1, window_bounds = array<i64: 7, 224>}, {transform_indices = @transform_2, window_bounds = array<i64: 8, 224>}]} {
    %c0 = arith.constant 0 : index
    %c0_0 = arith.constant 0 : index
    %0 = vector.load %arg1[%c0, %c0_0] : memref<8x7xi32, #tpu.memory_space<vmem>>, vector<8x7xi32>
    %1 = vector.shape_cast %0 : vector<8x7xi32> to vector<8x7x1xi32>
    %2 = vector.shape_cast %1 : vector<8x7x1xi32> to vector<8x7x1xi32>
    %3 = vector.broadcast %2 : vector<8x7x1xi32> to vector<8x7x32xi32>
    %4 = vector.shape_cast %3 : vector<8x7x32xi32> to vector<8x224xi32>
    %cst = arith.constant 0.000000e+00 : f32
    %5 = vector.broadcast %cst : f32 to vector<8x224xf32>
    %c0_1 = arith.constant 0 : index
    %c0_2 = arith.constant 0 : index
    %6 = vector.load %arg2[%c0_1, %c0_2] : memref<7x224xf32, #tpu.memory_space<vmem>>, vector<1x224xf32>
    %c0_i32 = arith.constant 0 : i32
    %7 = vector.broadcast %c0_i32 : i32 to vector<8x224xi32>
    %8 = arith.cmpi eq, %4, %7 : vector<8x224xi32>
    %9 = vector.shape_cast %6 : vector<1x224xf32> to vector<1x224xf32>
    %10 = vector.broadcast %9 : vector<1x224xf32> to vector<8x224xf32>
    %11 = arith.select %8, %10, %5 : vector<8x224xi1>, vector<8x224xf32>
    %c1 = arith.constant 1 : index
    %c0_3 = arith.constant 0 : index
    %12 = vector.load %arg2[%c1, %c0_3] : memref<7x224xf32, #tpu.memory_space<vmem>>, vector<1x224xf32>
    %c1_i32 = arith.constant 1 : i32
    %13 = vector.broadcast %c1_i32 : i32 to vector<8x224xi32>
    %14 = arith.cmpi eq, %4, %13 : vector<8x224xi32>
    %15 = vector.shape_cast %12 : vector<1x224xf32> to vector<1x224xf32>
    %16 = vector.broadcast %15 : vector<1x224xf32> to vector<8x224xf32>
    %17 = arith.select %14, %16, %11 : vector<8x224xi1>, vector<8x224xf32>
    %c2 = arith.constant 2 : index
    %c0_4 = arith.constant 0 : index
    %18 = vector.load %arg2[%c2, %c0_4] : memref<7x224xf32, #tpu.memory_space<vmem>>, vector<1x224xf32>
    %c2_i32 = arith.constant 2 : i32
    %19 = vector.broadcast %c2_i32 : i32 to vector<8x224xi32>
    %20 = arith.cmpi eq, %4, %19 : vector<8x224xi32>
    %21 = vector.shape_cast %18 : vector<1x224xf32> to vector<1x224xf32>
    %22 = vector.broadcast %21 : vector<1x224xf32> to vector<8x224xf32>
    %23 = arith.select %20, %22, %17 : vector<8x224xi1>, vector<8x224xf32>
    %c3 = arith.constant 3 : index
    %c0_5 = arith.constant 0 : index
    %24 = vector.load %arg2[%c3, %c0_5] : memref<7x224xf32, #tpu.memory_space<vmem>>, vector<1x224xf32>
    %c3_i32 = arith.constant 3 : i32
    %25 = vector.broadcast %c3_i32 : i32 to vector<8x224xi32>
    %26 = arith.cmpi eq, %4, %25 : vector<8x224xi32>
    %27 = vector.shape_cast %24 : vector<1x224xf32> to vector<1x224xf32>
    %28 = vector.broadcast %27 : vector<1x224xf32> to vector<8x224xf32>
    %29 = arith.select %26, %28, %23 : vector<8x224xi1>, vector<8x224xf32>
    %c4 = arith.constant 4 : index
    %c0_6 = arith.constant 0 : index
    %30 = vector.load %arg2[%c4, %c0_6] : memref<7x224xf32, #tpu.memory_space<vmem>>, vector<1x224xf32>
    %c4_i32 = arith.constant 4 : i32
    %31 = vector.broadcast %c4_i32 : i32 to vector<8x224xi32>
    %32 = arith.cmpi eq, %4, %31 : vector<8x224xi32>
    %33 = vector.shape_cast %30 : vector<1x224xf32> to vector<1x224xf32>
    %34 = vector.broadcast %33 : vector<1x224xf32> to vector<8x224xf32>
    %35 = arith.select %32, %34, %29 : vector<8x224xi1>, vector<8x224xf32>
    %c5 = arith.constant 5 : index
    %c0_7 = arith.constant 0 : index
    %36 = vector.load %arg2[%c5, %c0_7] : memref<7x224xf32, #tpu.memory_space<vmem>>, vector<1x224xf32>
    %c5_i32 = arith.constant 5 : i32
    %37 = vector.broadcast %c5_i32 : i32 to vector<8x224xi32>
    %38 = arith.cmpi eq, %4, %37 : vector<8x224xi32>
    %39 = vector.shape_cast %36 : vector<1x224xf32> to vector<1x224xf32>
    %40 = vector.broadcast %39 : vector<1x224xf32> to vector<8x224xf32>
    %41 = arith.select %38, %40, %35 : vector<8x224xi1>, vector<8x224xf32>
    %c6 = arith.constant 6 : index
    %c0_8 = arith.constant 0 : index
    %42 = vector.load %arg2[%c6, %c0_8] : memref<7x224xf32, #tpu.memory_space<vmem>>, vector<1x224xf32>
    %c6_i32 = arith.constant 6 : i32
    %43 = vector.broadcast %c6_i32 : i32 to vector<8x224xi32>
    %44 = arith.cmpi eq, %4, %43 : vector<8x224xi32>
    %45 = vector.shape_cast %42 : vector<1x224xf32> to vector<1x224xf32>
    %46 = vector.broadcast %45 : vector<1x224xf32> to vector<8x224xf32>
    %47 = arith.select %44, %46, %41 : vector<8x224xi1>, vector<8x224xf32>
    %c0_9 = arith.constant 0 : index
    %c0_10 = arith.constant 0 : index
    %48 = vector.load %arg3[%c0_9, %c0_10] : memref<8x224xf32, #tpu.memory_space<vmem>>, vector<8x224xf32>
    tpu.vector_store %arg3[%c0_9, %c0_10], %47 {strides = array<i32>} : memref<8x224xf32, #tpu.memory_space<vmem>>, vector<8x224xf32>,
    return
  }
  func.func @transform_0(%arg0: i32) -> (i32, i32) {
    %c0_i32 = arith.constant 0 : i32
    %c0_i32_0 = arith.constant 0 : i32
    return %arg0, %c0_i32 : i32, i32
  }
  func.func @transform_1(%arg0: i32) -> (i32, i32) {
    %c0_i32 = arith.constant 0 : i32
    %c0_i32_0 = arith.constant 0 : i32
    %c0_i32_1 = arith.constant 0 : i32
    return %c0_i32, %c0_i32_0 : i32, i32
  }
  func.func @transform_2(%arg0: i32) -> (i32, i32) {
    %c0_i32 = arith.constant 0 : i32
    %c0_i32_0 = arith.constant 0 : i32
    return %arg0, %c0_i32 : i32, i32
  }
}

</mosaic_0001>

<bundles_post_ra>
// kernel: tpu_custom_call.1
= control target key start
LH: loop header
LB: loop body
LE: loop exit
PB: predicated region body
PF: predicated region fallthrough
CT: control target
= control target key end

     0   :  { %7 = vsyncpa [#allocation3], 0  ;;  %s514_s0 = inlined_call_operand.hbm [shape: s32[8,7], index: 0, kind: input, shape index: {}]   ;;  %s515_s1 = inlined_call_operand.hbm [shape: f32[7,224], index: 1, kind: input, shape index: {}]   ;;  %s516_s2 = inlined_call_operand.hbm [shape: f32[8,224], index: 2, kind: output, shape index: {}]  }
   0x1   :  { %8 = vsyncpa [#allocation6], 0 }
   0x2   :  { %9 = vsyncpa [#allocation4], 0  ;;  %s456_s9 = smov [#allocation2]   ;;  %s457_s11 = smov [#allocation5]  }
   0x3   :  { %s16_s10 = sshll.u32 %s456_s9, 4  ;;  %s26_s12 = sshll.u32 %s457_s11, 4  ;;  %s17_s10 = int_to_ptr.vmem [resolvable:$true] %s16_s10  ;;  %s27_s12 = int_to_ptr.vmem [resolvable:$true] %s26_s12 }
   0x4   :  { %s398_s13 = scalar_lea.vmem %s17_s10, 128  ;;  %p403_p1 = scmp.lt.s32.totalorder %s17_s10, %s17_s10 }
   0x5   :  { %p399_p0 = scmp.ne.s32.totalorder %s17_s10, %s398_s13  ;;  %p404_p2 = scmp.lt.s32.totalorder %s398_s13, %s398_s13 }
   0x7   :  { %p405_p3 = por %p404_p2, %p403_p1 }
   0x9   :  { %p406_p4 = pnand %p405_p3, %p399_p0 }
   0xb   :  { %409 = shalt.err (!%p406_p4)
}
   0xc   :  { %19 = dma.hbm_to_vmem [thread:$0]  %s514_s0, 128, %s17_s10, [#allocation3]  }
   0xd   :  { %s418_s16 = scalar_lea.vmem %s27_s12, 256  ;;  %p423_p6 = scmp.lt.s32.totalorder %s27_s12, %s27_s12 }
   0xe   :  { %p419_p5 = scmp.ne.s32.totalorder %s27_s12, %s418_s16  ;;  %p424_p7 = scmp.lt.s32.totalorder %s418_s16, %s418_s16 }
  0x10   :  { %p425_p8 = por %p424_p7, %p423_p6 }
  0x12   :  { %p426_p9 = pnand %p425_p8, %p419_p5 }
  0x14   :  { %429 = shalt.err (!%p426_p9)
}
  0x15   :  { %29 = dma.hbm_to_vmem [thread:$0]  %s515_s1, 256, %s27_s12, [#allocation6]  }
  0x16   :  { %450 = dma.done.wait [#allocation3], 128  }
  0x17   :  { %451 = vsyncadd [#allocation3], 4294967168 }
  0x18   :  { %452 = dma.done.wait [#allocation6], 256  }
  0x19   :  { %453 = vsyncadd [#allocation6], 4294967040  ;;  %v37_v0 = vlaneseq  ;;  %v36_v6 = vld [vmem:[#allocation2] sm:$0xff]  ;;  %v458_v20 = vmov 1983009808   ;;  %s460_s0 = smov 64  }
  0x1a   :  { %v96_v21 = vunpack.c.l.s4 %v458_v20  ;;  %v459_v27 = vmov 1934713408   ;;  %s461_s1 = smov 32   ;;  %s462_s19 = smov 96   ;;  %vm238_vm0 = vcmask 261120   ;;  %vm240_vm1 = vcmask 523264  }
  0x1b   :  { %v38_v1 = vshrl.u32 %v37_v0, 7  ;;  %v160_v28 = vunpack.c.l.s4 %v459_v27  ;;  %vm242_vm2 = vcmask 785408   ;;  %s463_s20 = smov [#allocation7]  }
  0x1c   :  { %v97_v23 = vunpack.c.0.s8 %v96_v21  ;;  %s372_s21 = sshll.u32 %s463_s20, 4  ;;  %s373_s21 = int_to_ptr.vmem [resolvable:$true] %s372_s21 }
  0x1d   :  { %v53_v2 = vsub.s32 2, %v38_v1  ;;  %v485_v3 = vsub.s32 0, %v38_v1  ;;  %v60_v4 = vsub.s32 3, %v38_v1  ;;  %v487_v5 = vsub.s32 1, %v38_v1  ;;  %s430_s22 = scalar_lea.vmem %s373_s21, 256  ;;  %p435_p11 = scmp.lt.s32.totalorder %s373_s21, %s373_s21 }
  0x1e   :  { %v74_v11 = vsub.s32 5, %v38_v1  ;;  %v67_v12 = vsub.s32 4, %v38_v1  ;;  %v88_v15 = vsub.s32 7, %v38_v1  ;;  %v81_v16 = vsub.s32 6, %v38_v1  ;;  %p431_p10 = scmp.ne.s32.totalorder %s373_s21, %s430_s22  ;;  %p436_p12 = scmp.lt.s32.totalorder %s430_s22, %s430_s22 }
  0x1f   :  { %v54_v7 = vrot.slane %v36_v6, %v53_v2  ;;  %v40_v8 = vrot.slane %v36_v6, %v485_v3  ;;  %v61_v9 = vrot.slane %v36_v6, %v60_v4  ;;  %v47_v10 = vrot.slane %v36_v6, %v487_v5 }
  0x20   :  { %v75_v13 = vrot.slane %v36_v6, %v74_v11  ;;  %v68_v14 = vrot.slane %v36_v6, %v67_v12  ;;  %v89_v17 = vrot.slane %v36_v6, %v88_v15  ;;  %v82_v18 = vrot.slane %v36_v6, %v81_v16  ;;  %v263_v16 = vld [vmem:[#allocation5 + $0x1] ss:$8 sm:$0x3]  ;;  %p437_p13 = por %p436_p12, %p435_p11 }
  0x21   :  { %56 = vbcast.lane.b32.xlu1 %v54_v7, 256  ;;  %42 = vbcast.lane.b32.xlu0 %v40_v8, 256  ;;  %v100_v29 = vsub.s32 %v97_v23, %v38_v1  ;;  %v161_v36 = vunpack.c.0.s8 %v160_v28  ;;  %v270_v23 = vrot.slane %v263_v16, %v485_v3 }
  0x22   :  { %p438_p0 = pnand %p437_p13, %p431_p10 }
  0x23   :  { %v164_v48 = vsub.s32 %v161_v36, %v38_v1 }
  0x25   :  { %63 = vbcast.lane.b32.xlu1 %v61_v9, 256  ;;  %49 = vbcast.lane.b32.xlu0 %v47_v10, 256 }
  0x29   :  { %77 = vbcast.lane.b32.xlu1 %v75_v13, 256  ;;  %70 = vbcast.lane.b32.xlu0 %v68_v14, 256  ;;  %v246_v14 = vld [vmem:[#allocation5] ss:$8 sm:$0x3] }
  0x2a   :  { %v257_v27 = vrot.slane %v246_v14, %v487_v5 }
  0x2d   :  { %91 = vbcast.lane.b32.xlu1 %v89_v17, 256  ;;  %84 = vbcast.lane.b32.xlu0 %v82_v18, 256  ;;  %v280_v17 = vld [vmem:[#allocation5 + $0x2] ss:$8 sm:$0x3]  ;;  %v253_v18 = vrot.slane %v246_v14, %v485_v3 }
  0x2e   :  { %v287_v28 = vrot.slane %v280_v17, %v485_v3 }
  0x93   :  { %v57_v19 = vpop.permute.xlu1 %56  ;;  %v43_v22 = vpop.permute.xlu0 %42 }
  0x94   :  { %v93_v30 = vcombine.low %v43_v22, %v57_v19  ;;  %v94_v34 = vcombine.high %v43_v22, %v57_v19  ;;  %v297_v19 = vld [vmem:[#allocation5 + $0x3] ss:$8 sm:$0x3] }
  0x96   :  { %v101_v37 = vrot.slane %v93_v30, %v100_v29  ;;  %v108_v45 = vrot.slane %v94_v34, %v100_v29  ;;  %v304_v30 = vrot.slane %v297_v19, %v485_v3 }
  0x97   :  { %v64_v24 = vpop.permute.xlu1 %63  ;;  %v50_v25 = vpop.permute.xlu0 %49 }
  0x98   :  { %v109_v26 = vcombine.low %v50_v25, %v64_v24  ;;  %v110_v31 = vcombine.high %v50_v25, %v64_v24  ;;  %v314_v24 = vld [vmem:[#allocation5 + $0x4] ss:$8 sm:$0x3]  ;;  %v331_v25 = vld [vmem:[#allocation5 + $0x5] ss:$8 sm:$0x3] }
  0x99   :  { %v321_v34 = vrot.slane %v314_v24, %v485_v3 }
  0x9a   :  { %v117_v35 = vrot.slane %v109_v26, %v100_v29  ;;  %v124_v38 = vrot.slane %v110_v31, %v100_v29  ;;  %v348_v31 = vld [vmem:[#allocation5 + $0x6] ss:$8 sm:$0x3] }
  0x9b   :  { %v78_v32 = vpop.permute.xlu1 %77  ;;  %v71_v33 = vpop.permute.xlu0 %70 }
  0x9c   :  { %v157_v46 = vcombine.low %v101_v37, %v117_v35  ;;  %v158_v47 = vcombine.high %v101_v37, %v117_v35  ;;  %v173_v53 = vcombine.low %v108_v45, %v124_v38  ;;  %v174_v1 = vcombine.high %v108_v45, %v124_v38 }
  0x9d   :  { %v338_v35 = vrot.slane %v331_v25, %v485_v3 }
  0x9e   :  { %v172_v57 = vrot.slane %v158_v47, %v164_v48  ;;  %v165_v59 = vrot.slane %v157_v46, %v164_v48  ;;  %v181_v62 = vrot.slane %v173_v53, %v164_v48  ;;  %v188_v10 = vrot.slane %v174_v1, %v164_v48 }
  0x9f   :  { %v92_v39 = vpop.permute.xlu1 %91  ;;  %v85_v40 = vpop.permute.xlu0 %84  ;;  %v359_v47 = vrot.slane %v348_v31, %v487_v5 }
  0xa0   :  { %v141_v41 = vcombine.low %v78_v32, %v92_v39  ;;  %v142_v42 = vcombine.high %v78_v32, %v92_v39  ;;  %v125_v43 = vcombine.low %v71_v33, %v85_v40  ;;  %v126_v44 = vcombine.high %v71_v33, %v85_v40 }
  0xa1   :  { %v291_v33 = vrot.slane %v280_v17, %v487_v5  ;;  %v308_v39 = vrot.slane %v297_v19, %v487_v5 }
  0xa2   :  { %v149_v49 = vrot.slane %v141_v41, %v100_v29  ;;  %v156_v50 = vrot.slane %v142_v42, %v100_v29  ;;  %v133_v51 = vrot.slane %v125_v43, %v100_v29  ;;  %v140_v52 = vrot.slane %v126_v44, %v100_v29 }
  0xa3   :  { %v274_v29 = vrot.slane %v263_v16, %v487_v5  ;;  %v325_v42 = vrot.slane %v314_v24, %v487_v5  ;;  %v355_v43 = vrot.slane %v348_v31, %v485_v3  ;;  %v342_v44 = vrot.slane %v331_v25, %v487_v5 }
  0xa4   :  { %v189_v54 = vcombine.low %v133_v51, %v149_v49  ;;  %v190_v55 = vcombine.high %v133_v51, %v149_v49  ;;  %v205_v56 = vcombine.low %v140_v52, %v156_v50  ;;  %v206_v63 = vcombine.high %v140_v52, %v156_v50 }
  0xa6   :  { %v204_v58 = vrot.slane %v190_v55, %v164_v48  ;;  %v197_v60 = vrot.slane %v189_v54, %v164_v48  ;;  %v213_v61 = vrot.slane %v205_v56, %v164_v48  ;;  %v220_v9 = vrot.slane %v206_v63, %v164_v48 }
  0xa8   :  { %v223_v0 = vcombine.low %v172_v57, %v204_v58  ;;  %v222_v2 = vcombine.high %v165_v59, %v197_v60  ;;  %v221_v4 = vcombine.low %v165_v59, %v197_v60  ;;  %v225_v6 = vcombine.low %v181_v62, %v213_v61 }
  0xa9   :  { %v224_v7 = vcombine.high %v172_v57, %v204_v58  ;;  %v226_v8 = vcombine.high %v181_v62, %v213_v61  ;;  %v227_v11 = vcombine.low %v188_v10, %v220_v9 }
  0xaa   :  { %230 = vrot.lane.b32.xlu1 %v223_v0, %s460_s0  ;;  %228 = vrot.lane.b32.xlu0 %v222_v2, %s461_s1 }
  0xae   :  { %232 = vrot.lane.b32.xlu1 %v224_v7, %s462_s19  ;;  %234 = vrot.lane.b32.xlu0 %v226_v8, %s461_s1 }
  0xb2   :  { %236 = vrot.lane.b32.xlu0 %v227_v11, %s460_s0 }
 0x11c   :  { %v231_v12 = vpop.permute.xlu1 %230  ;;  %v229_v13 = vpop.permute.xlu0 %228 }
 0x11d   :  { %v239_v15 = vsel %vm238_vm0, %v221_v4, %v229_v13 }
 0x11e   :  { %v241_v21 = vsel %vm240_vm1, %v239_v15, %v231_v12 }
 0x120   :  { %v233_v20 = vpop.permute.xlu1 %232  ;;  %v235_v22 = vpop.permute.xlu0 %234 }
 0x121   :  { %v243_v26 = vsel %vm242_vm2, %v241_v21, %v233_v20  ;;  %v244_v36 = vsel %vm238_vm0, %v225_v6, %v235_v22 }
 0x122   :  { %vm247_vm3 = vcmp.eq.s32.totalorder %v243_v26, 0  ;;  %vm264_vm4 = vcmp.eq.s32.totalorder %v243_v26, 1  ;;  %vm281_vm5 = vcmp.eq.s32.totalorder %v243_v26, 2  ;;  %vm298_vm8 = vcmp.eq.s32.totalorder %v243_v26, 3 }
 0x123   :  { %v260_v32 = vsel %vm247_vm3, %v253_v18, 0.0  ;;  %vm315_vm9 = vcmp.eq.s32.totalorder %v243_v26, 4  ;;  %vm332_vm11 = vcmp.eq.s32.totalorder %v243_v26, 5  ;;  %vm349_vm13 = vcmp.eq.s32.totalorder %v243_v26, 6 }
 0x124   :  { %v237_v37 = vpop.permute.xlu0 %236  ;;  %v277_v38 = vsel %vm264_vm4, %v270_v23, %v260_v32 }
 0x125   :  { %v245_v40 = vsel %vm240_vm1, %v244_v36, %v237_v37  ;;  %v294_v41 = vsel %vm281_vm5, %v287_v28, %v277_v38 }
 0x126   :  { %vm248_vm6 = vcmp.eq.s32.totalorder %v245_v40, 0  ;;  %vm265_vm7 = vcmp.eq.s32.totalorder %v245_v40, 1  ;;  %v311_v46 = vsel %vm298_vm8, %v304_v30, %v294_v41  ;;  %vm282_vm10 = vcmp.eq.s32.totalorder %v245_v40, 2 }
 0x127   :  { %v261_v45 = vsel %vm248_vm6, %v257_v27, 0.0  ;;  %v328_v49 = vsel %vm315_vm9, %v321_v34, %v311_v46  ;;  %vm299_vm12 = vcmp.eq.s32.totalorder %v245_v40, 3  ;;  %vm316_vm14 = vcmp.eq.s32.totalorder %v245_v40, 4 }
 0x128   :  { %v278_v48 = vsel %vm265_vm7, %v274_v29, %v261_v45  ;;  %v345_v51 = vsel %vm332_vm11, %v338_v35, %v328_v49  ;;  %vm333_vm15 = vcmp.eq.s32.totalorder %v245_v40, 5  ;;  %vm350_vm0 = vcmp.eq.s32.totalorder %v245_v40, 6 }
 0x129   :  { %v295_v50 = vsel %vm282_vm10, %v291_v33, %v278_v48  ;;  %v362_v52 = vsel %vm349_vm13, %v355_v43, %v345_v51 }
 0x12a   :  { %v312_v3 = vsel %vm299_vm12, %v308_v39, %v295_v50  ;;  %364 = vst [vmem:[#allocation7] sm:$0xff] %v362_v52 }
 0x12b   :  { %v329_v53 = vsel %vm316_vm14, %v325_v42, %v312_v3 }
 0x12c   :  { %v346_v54 = vsel %vm333_vm15, %v342_v44, %v329_v53 }
 0x12d   :  { %v363_v5 = vsel %vm350_vm0, %v359_v47, %v346_v54 }
 0x12e   :  { %365 = vst.msk [vmem:[#allocation7 + $0x8] sm:$0xff] %vm242_vm2, %v363_v5 }
 0x12f   :  { %441 = shalt.err (!%p438_p0)
}
 0x130   :  { %375 = dma.vmem_to_hbm [thread:$0]  %s373_s21, 256, %s516_s2, [#allocation4]  }
 0x131   :  { %454 = dma.done.wait [#allocation4], 256  }
 0x132   :  { %455 = vsyncadd [#allocation4], 4294967040 }
 0x133   :  { %379 = vsyncpa [#allocation3], 1 }
 0x134   :  { %380 = vsyncpa [#allocation6], 1 }
 0x135   :  { %381 = vsyncpa [#allocation4], 1 }

</bundles_post_ra>
